<compile_context>
chip_gen: v7x
topology: tpu7x:2x2x1
jax: 0.10.0
libtpu: 0.0.40
codegen_flags: <defaults>
</compile_context>

<pallas_src>
import functools

import jax
import jax.numpy as jnp
from jax.experimental import pallas as pl
from jax.experimental.pallas import tpu as pltpu


def _round_up(x, m):
    return ((x + m - 1) // m) * m


# -----------------------------------------------------------------------------
# Hardware introspection (generation-aware tiling), with safe fallbacks.
# -----------------------------------------------------------------------------
def _tpu_params():
    """Returns (vmem_capacity_bytes, num_tensorcores_per_chip)."""
    vmem_cap = 64 * 1024 * 1024          # v7x lower bound -> safe everywhere
    num_tc = 1                           # v5e / v6e: one TensorCore
    try:
        info_fn = getattr(pltpu, "get_tpu_info", None)
        if info_fn is not None:
            vmem_cap = int(info_fn().vmem_capacity_bytes)
    except Exception:
        pass
    try:
        kind = jax.devices()[0].device_kind.lower()
        if "v7" in kind:
            num_tc = 2                   # v7x: 2 TensorCores per chip
    except Exception:
        pass
    return vmem_cap, num_tc


# -----------------------------------------------------------------------------
# Kernel
# -----------------------------------------------------------------------------
def _fusion_soft_kernel(vd_ref, id_ref, wv_ref, wi_ref, b_ref, o_ref, *,
                        pack, v_len, i_len):
    # vd_ref: (tm, pack*v_len)   -- `pack` logical rows packed along lanes
    # id_ref: (tm, pack*i_len)
    # wv_ref: (pack*v_len, pack*f_len)   block-structured copies of W^T[:v_len]
    # wi_ref: (pack*i_len, pack*f_len)   block-structured copies of W^T[v_len:]
    # b_ref : (1, pack*f_len)            bias tiled `pack` times (f32)
    # o_ref : (tm, pack*f_len)           lane-dense output
    vd = vd_ref[...]
    idt = id_ref[...]

    # feat_cat in lane-dense layout: [v_0 | i_0 | v_1 | i_1 | ...] per row.
    pieces = []
    for j in range(pack):
        pieces.append(vd[:, j * v_len:(j + 1) * v_len])
        pieces.append(idt[:, j * i_len:(j + 1) * i_len])
    feat = jnp.concatenate(pieces, axis=-1)

    # weights = feat_cat @ W^T + b, computed without feeding the concat result
    # to the MXU (Wv / Wi already encode the row-packing block structure).
    # Accumulation stays f32 even for bf16 inputs/weights.
    w = (jnp.dot(vd, wv_ref[...], preferred_element_type=jnp.float32)
         + jnp.dot(idt, wi_ref[...], preferred_element_type=jnp.float32)
         + b_ref[...])

    o_ref[...] = (feat.astype(jnp.float32) * w).astype(o_ref.dtype)


# -----------------------------------------------------------------------------
# Packing / tiling heuristics
# -----------------------------------------------------------------------------
def _choose_pack(v_len, i_len, f_len):
    # Smallest pack giving lane-dense (128-multiple) *output* blocks; among
    # those, prefer one that also makes the *input* blocks lane-dense.  Cap
    # pack*f_len so the duplicated block-structured weight stays small.
    cands = [p for p in (1, 2, 4, 8)
             if (p * f_len) % 128 == 0 and p * f_len <= 1024]
    if not cands:
        return 1          # odd f_len: masked output stores (correct, slower)
    for p in cands:
        if (p * v_len) % 128 == 0 and (p * i_len) % 128 == 0:
            return p
    return cands[0]


def _derive_row_tile(Nd, pack, v_len, i_len, f_len, itemsize,
                     tm_rows, vmem_cap, num_tc):
    dense_w = pack * f_len
    vlanes = _round_up(pack * v_len, 128)
    ilanes = _round_up(pack * i_len, 128)
    olanes = _round_up(dense_w, 128)
    # Double-buffered (pipelined) VMEM bytes per packed row for the streams.
    per_row = 2 * (vlanes + ilanes + olanes) * itemsize
    # Resident weights + bias (counted double-buffered to be conservative).
    weights = 2 * ((_round_up(pack * v_len, 8) + _round_up(pack * i_len, 8))
                   * olanes * itemsize + 8 * olanes * 4)
    budget = int(0.6 * vmem_cap)
    tm_vmem = max(8, ((budget - weights) // per_row) // 8 * 8)
    tm_user = max(8, _round_up(max(1, tm_rows // pack), 8))

    # Minimum number of tiles implied by VMEM and by the requested tile size.
    g = max(pl.cdiv(Nd, tm_vmem), pl.cdiv(Nd, tm_user), 1)
    # Split for megacore only on multi-TC chips (v7x) and only when there is
    # enough work; keep the tile count a multiple of the core count so both
    # cores get near-equal, non-sliver tiles.
    if num_tc > 1 and Nd >= 512:
        g = max(g, num_tc)
        if g % num_tc:
            g += num_tc - (g % num_tc)
    tm = _round_up(pl.cdiv(Nd, g), 8)
    if tm >= Nd:
        tm = Nd                      # single full-extent tile (any size OK)
    return tm


# -----------------------------------------------------------------------------
# One-time parameter packing (call once per set of Linear weights).
# -----------------------------------------------------------------------------
def prepare_fusion_soft_params(W, b, v_len, i_len, *, compute_dtype=None):
    """Packs the PyTorch Linear params (W: (f_len, f_len), b: (f_len,)).

    compute_dtype (e.g. jnp.bfloat16) selects the streaming dtype for inputs,
    weights and output; matmul accumulation stays f32 inside the kernel.
    """
    f_len = v_len + i_len
    dtype = (jnp.dtype(compute_dtype) if compute_dtype is not None
             else jnp.result_type(W))
    pack = _choose_pack(v_len, i_len, f_len)
    dense_w = pack * f_len

    Wt = jnp.asarray(W, dtype).T                      # feat @ Wt == feat @ W^T
    Wv = jnp.zeros((pack * v_len, dense_w), dtype)
    Wi = jnp.zeros((pack * i_len, dense_w), dtype)
    for j in range(pack):
        Wv = Wv.at[j * v_len:(j + 1) * v_len,
                   j * f_len:(j + 1) * f_len].set(Wt[:v_len])
        Wi = Wi.at[j * i_len:(j + 1) * i_len,
                   j * f_len:(j + 1) * f_len].set(Wt[v_len:])
    Bd = jnp.tile(jnp.asarray(b, jnp.float32).reshape(1, f_len), (1, pack))
    return dict(Wv=Wv, Wi=Wi, Bd=Bd, pack=pack,
                v_len=v_len, i_len=i_len, dtype=dtype)


# -----------------------------------------------------------------------------
# Apply (per-step call): (B, T, v_len), (B, T, i_len) -> (B, T, f_len)
# -----------------------------------------------------------------------------
def fusion_module_soft(v, i, params, *, tm_rows=8192):
    pack = params["pack"]
    v_len, i_len = params["v_len"], params["i_len"]
    f_len = v_len + i_len
    dtype = params["dtype"]
    Wv, Wi, Bd = params["Wv"], params["Wi"], params["Bd"]

    B, T, _ = v.shape
    assert v.shape[-1] == v_len and i.shape[-1] == i_len
    N = B * T
    dense_w = pack * f_len

    v2 = jnp.asarray(v, dtype).reshape(N, v_len)
    i2 = jnp.asarray(i, dtype).reshape(N, i_len)
    pad = (-N) % pack
    if pad:
        v2 = jnp.pad(v2, ((0, pad), (0, 0)))
        i2 = jnp.pad(i2, ((0, pad), (0, 0)))
    Nd = (N + pad) // pack

    # Metadata-only reshapes: packed row p holds logical rows pack*p..pack*p+pack-1.
    Vd = v2.reshape(Nd, pack * v_len)
    Id = i2.reshape(Nd, pack * i_len)

    vmem_cap, num_tc = _tpu_params()
    itemsize = jnp.dtype(dtype).itemsize
    tm = _derive_row_tile(Nd, pack, v_len, i_len, f_len, itemsize,
                          tm_rows, vmem_cap, num_tc)
    grid = (pl.cdiv(Nd, tm),)          # partial last tile is masked by Pallas
    vmem_limit = max(32 * 1024 * 1024,
                     min(int(0.75 * vmem_cap), 96 * 1024 * 1024))

    kernel = functools.partial(_fusion_soft_kernel,
                               pack=pack, v_len=v_len, i_len=i_len)

    out_d = pl.pallas_call(
        kernel,
        out_shape=jax.ShapeDtypeStruct((Nd, dense_w), dtype),
        grid_spec=pltpu.PrefetchScalarGridSpec(
            num_scalar_prefetch=0,
            grid=grid,
            in_specs=[
                pl.BlockSpec((tm, pack * v_len), lambda m: (m, 0)),
                pl.BlockSpec((tm, pack * i_len), lambda m: (m, 0)),
                pl.BlockSpec((pack * v_len, dense_w), lambda m: (0, 0)),
                pl.BlockSpec((pack * i_len, dense_w), lambda m: (0, 0)),
                pl.BlockSpec((1, dense_w), lambda m: (0, 0)),
            ],
            out_specs=pl.BlockSpec((tm, dense_w), lambda m: (m, 0)),
        ),
        compiler_params=pltpu.CompilerParams(
            dimension_semantics=("parallel",),
            vmem_limit_bytes=vmem_limit,
        ),
    )(Vd, Id, Wv, Wi, Bd)

    # Undo the row packing (free reshape), drop pad rows, restore (B, T, f_len).
    return out_d.reshape(Nd * pack, f_len)[:N].reshape(B, T, f_len)

    # TODO(synk): the FlowNet-style image encoder, the 1-D conv inertial
    # encoder, the 2-layer LSTM Pose_RNN and the 'hard' (gumbel-softmax)
    # fusion path are left to XLA — no clean single-kernel Pallas equivalent.


if __name__ == "__main__":
    # Small shapes consistent with the module: batch=2, seq=8,
    # v_f_len=32, i_f_len=32 -> f_len=64 (lane-dense path with pack=4).
    B, T, v_len, i_len = 2, 8, 32, 32
    f_len = v_len + i_len

    key = jax.random.PRNGKey(0)
    kv, ki, kw, kb = jax.random.split(key, 4)
    v = jax.random.normal(kv, (B, T, v_len), dtype=jnp.float32)
    i = jax.random.normal(ki, (B, T, i_len), dtype=jnp.float32)
    # Synthetic Linear params (PyTorch Linear: weight (f_len, f_len), bias (f_len,)).
    W = jax.random.normal(kw, (f_len, f_len), dtype=jnp.float32) * 0.05
    b = jax.random.normal(kb, (f_len,), dtype=jnp.float32) * 0.05

    # Reference in plain JAX (same math as the PyTorch 'soft' path).
    feat_cat = jnp.concatenate([v, i], axis=-1)
    ref = feat_cat * (jnp.einsum('btf,gf->btg', feat_cat, W) + b)

    # Default f32 path.
    params = prepare_fusion_soft_params(W, b, v_len, i_len)
    out = jax.block_until_ready(fusion_module_soft(v, i, params))
    assert out.shape == (B, T, f_len)
    assert jnp.allclose(out, ref, atol=1e-5, rtol=1e-5)

    # Opt-in bf16 streaming path (f32 accumulation inside the kernel).
    params_bf16 = prepare_fusion_soft_params(W, b, v_len, i_len,
                                             compute_dtype=jnp.bfloat16)
    out_bf16 = jax.block_until_ready(fusion_module_soft(v, i, params_bf16))
    assert out_bf16.shape == (B, T, f_len)
    assert jnp.allclose(out_bf16.astype(jnp.float32), ref, atol=0.25, rtol=0.05)

    print("KERNEL_OK")
</pallas_src>

<mosaic_0001>
module attributes {stable_mosaic.version = 11 : i64} {
  func.func @_fusion_soft_kernel(%arg0: i32, %arg1: memref<4x128xf32, #tpu.memory_space<vmem>>, %arg2: memref<4x128xf32, #tpu.memory_space<vmem>>, %arg3: memref<128x256xf32, #tpu.memory_space<vmem>>, %arg4: memref<128x256xf32, #tpu.memory_space<vmem>>, %arg5: memref<1x256xf32, #tpu.memory_space<vmem>>, %arg6: memref<4x256xf32, #tpu.memory_space<vmem>>) attributes {dimension_semantics = [#tpu.dimension_semantics<parallel>], iteration_bounds = array<i64: 1>, scalar_prefetch = 0 : i64, scratch_operands = 0 : i64, tpu.core_type = #tpu.core_type<tc>, window_params = [{transform_indices = @transform_0, window_bounds = array<i64: 4, 128>}, {transform_indices = @transform_1, window_bounds = array<i64: 4, 128>}, {pipeline_mode = #tpu.pipeline_mode<synchronous>, transform_indices = @transform_2, window_bounds = array<i64: 128, 256>}, {pipeline_mode = #tpu.pipeline_mode<synchronous>, transform_indices = @transform_3, window_bounds = array<i64: 128, 256>}, {pipeline_mode = #tpu.pipeline_mode<synchronous>, transform_indices = @transform_4, window_bounds = array<i64: 1, 256>}, {transform_indices = @transform_5, window_bounds = array<i64: 4, 256>}]} {
    %c0 = arith.constant 0 : index
    %c0_0 = arith.constant 0 : index
    %0 = vector.load %arg1[%c0, %c0_0] : memref<4x128xf32, #tpu.memory_space<vmem>>, vector<4x128xf32>
    %c0_1 = arith.constant 0 : index
    %c0_2 = arith.constant 0 : index
    %1 = vector.load %arg2[%c0_1, %c0_2] : memref<4x128xf32, #tpu.memory_space<vmem>>, vector<4x128xf32>
    %2 = vector.extract_strided_slice %0 {offsets = [0, 0], sizes = [4, 32], strides = [1, 1]} : vector<4x128xf32> to vector<4x32xf32>
    %3 = vector.extract_strided_slice %1 {offsets = [0, 0], sizes = [4, 32], strides = [1, 1]} : vector<4x128xf32> to vector<4x32xf32>
    %4 = vector.extract_strided_slice %0 {offsets = [0, 32], sizes = [4, 32], strides = [1, 1]} : vector<4x128xf32> to vector<4x32xf32>
    %5 = vector.extract_strided_slice %1 {offsets = [0, 32], sizes = [4, 32], strides = [1, 1]} : vector<4x128xf32> to vector<4x32xf32>
    %6 = vector.extract_strided_slice %0 {offsets = [0, 64], sizes = [4, 32], strides = [1, 1]} : vector<4x128xf32> to vector<4x32xf32>
    %7 = vector.extract_strided_slice %1 {offsets = [0, 64], sizes = [4, 32], strides = [1, 1]} : vector<4x128xf32> to vector<4x32xf32>
    %8 = vector.extract_strided_slice %0 {offsets = [0, 96], sizes = [4, 32], strides = [1, 1]} : vector<4x128xf32> to vector<4x32xf32>
    %9 = vector.extract_strided_slice %1 {offsets = [0, 96], sizes = [4, 32], strides = [1, 1]} : vector<4x128xf32> to vector<4x32xf32>
    %10 = tpu.concatenate %2, %3, %4, %5, %6, %7, %8, %9 in 1 : vector<4x32xf32>, vector<4x32xf32>, vector<4x32xf32>, vector<4x32xf32>, vector<4x32xf32>, vector<4x32xf32>, vector<4x32xf32>, vector<4x32xf32> -> vector<4x256xf32>
    %c0_3 = arith.constant 0 : index
    %c0_4 = arith.constant 0 : index
    %11 = vector.load %arg3[%c0_3, %c0_4] : memref<128x256xf32, #tpu.memory_space<vmem>>, vector<128x256xf32>
    %cst = arith.constant dense<0.000000e+00> : vector<4x256xf32>
    %12 = tpu.matmul %0, %11, %cst {dimension_numbers = #tpu.dot_dimension_numbers<[1], [0], [0], [1], [0, 0, 1, 1], [], []>} : vector<4x128xf32>, vector<128x256xf32>, vector<4x256xf32> -> vector<4x256xf32>
    %c0_5 = arith.constant 0 : index
    %c0_6 = arith.constant 0 : index
    %13 = vector.load %arg4[%c0_5, %c0_6] : memref<128x256xf32, #tpu.memory_space<vmem>>, vector<128x256xf32>
    %cst_7 = arith.constant dense<0.000000e+00> : vector<4x256xf32>
    %14 = tpu.matmul %1, %13, %cst_7 {dimension_numbers = #tpu.dot_dimension_numbers<[1], [0], [0], [1], [0, 0, 1, 1], [], []>} : vector<4x128xf32>, vector<128x256xf32>, vector<4x256xf32> -> vector<4x256xf32>
    %15 = arith.addf %12, %14 : vector<4x256xf32>
    %c0_8 = arith.constant 0 : index
    %c0_9 = arith.constant 0 : index
    %16 = vector.load %arg5[%c0_8, %c0_9] : memref<1x256xf32, #tpu.memory_space<vmem>>, vector<1x256xf32>
    %17 = vector.broadcast %16 : vector<1x256xf32> to vector<4x256xf32>
    %18 = arith.addf %15, %17 : vector<4x256xf32>
    %19 = arith.mulf %10, %18 : vector<4x256xf32>
    %c0_10 = arith.constant 0 : index
    %c0_11 = arith.constant 0 : index
    %20 = vector.load %arg6[%c0_10, %c0_11] : memref<4x256xf32, #tpu.memory_space<vmem>>, vector<4x256xf32>
    tpu.vector_store %arg6[%c0_10, %c0_11], %19 {strides = array<i32>} : memref<4x256xf32, #tpu.memory_space<vmem>>, vector<4x256xf32>,
    return
  }
  func.func @transform_0(%arg0: i32) -> (i32, i32) {
    %c0_i32 = arith.constant 0 : i32
    %c0_i32_0 = arith.constant 0 : i32
    return %arg0, %c0_i32 : i32, i32
  }
  func.func @transform_1(%arg0: i32) -> (i32, i32) {
    %c0_i32 = arith.constant 0 : i32
    %c0_i32_0 = arith.constant 0 : i32
    return %arg0, %c0_i32 : i32, i32
  }
  func.func @transform_2(%arg0: i32) -> (i32, i32) {
    %c0_i32 = arith.constant 0 : i32
    %c0_i32_0 = arith.constant 0 : i32
    %c0_i32_1 = arith.constant 0 : i32
    return %c0_i32, %c0_i32_0 : i32, i32
  }
  func.func @transform_3(%arg0: i32) -> (i32, i32) {
    %c0_i32 = arith.constant 0 : i32
    %c0_i32_0 = arith.constant 0 : i32
    %c0_i32_1 = arith.constant 0 : i32
    return %c0_i32, %c0_i32_0 : i32, i32
  }
  func.func @transform_4(%arg0: i32) -> (i32, i32) {
    %c0_i32 = arith.constant 0 : i32
    %c0_i32_0 = arith.constant 0 : i32
    %c0_i32_1 = arith.constant 0 : i32
    return %c0_i32, %c0_i32_0 : i32, i32
  }
  func.func @transform_5(%arg0: i32) -> (i32, i32) {
    %c0_i32 = arith.constant 0 : i32
    %c0_i32_0 = arith.constant 0 : i32
    return %arg0, %c0_i32 : i32, i32
  }
}

</mosaic_0001>

<bundles_post_ra>
// kernel: tpu_custom_call.1
= control target key start
LH: loop header
LB: loop body
LE: loop exit
PB: predicated region body
PF: predicated region fallthrough
CT: control target
= control target key end

     0   :  { %10 = vsyncpa [#allocation3], 0  ;;  %s653_s0 = inlined_call_operand.hbm [shape: f32[4,128], index: 0, kind: input, shape index: {}]   ;;  %s654_s1 = inlined_call_operand.hbm [shape: f32[4,128], index: 1, kind: input, shape index: {}]   ;;  %s655_s2 = inlined_call_operand.hbm [shape: f32[128,256], index: 2, kind: input, shape index: {}]   ;;  %s656_s3 = inlined_call_operand.hbm [shape: f32[128,256], index: 3, kind: input, shape index: {}]   ;;  %s657_s4 = inlined_call_operand.vmem [shape: f32[1,256], index: 4, kind: input, shape index: {}]   ;;  %s658_s5 = inlined_call_operand.hbm [shape: f32[4,256], index: 5, kind: output, shape index: {}]  }
   0x1   :  { %11 = vsyncpa [#allocation6], 0 }
   0x2   :  { %12 = vsyncpa [#allocation9], 0 }
   0x3   :  { %13 = vsyncpa [#allocation4], 0  ;;  %s542_s18 = smov [#allocation5]   ;;  %s543_s20 = smov [#allocation2]  }
   0x4   :  { %s30_s19 = sshll.u32 %s542_s18, 4  ;;  %s20_s21 = sshll.u32 %s543_s20, 4  ;;  %s31_s19 = int_to_ptr.vmem [resolvable:$true] %s30_s19  ;;  %s21_s21 = int_to_ptr.vmem [resolvable:$true] %s20_s21 }
   0x5   :  { %s424_s24 = scalar_lea.hbm %s654_s1, 64 }
   0x6   :  { %p425_p0 = scmp.ne.s32.totalorder %s654_s1, %s424_s24  ;;  %p428_p1 = scmp.lt.u32.totalorder %s424_s24, %s654_s1 }
   0x8   :  { %p430_p2 = pnand %p428_p1, %p425_p0 }
   0xa   :  { %433 = shalt.err (!%p430_p2)
}
   0xb   :  { %s434_s29 = scalar_lea.vmem %s31_s19, 64  ;;  %p439_p4 = scmp.lt.s32.totalorder %s31_s19, %s31_s19 }
   0xc   :  { %p435_p3 = scmp.ne.s32.totalorder %s31_s19, %s434_s29  ;;  %p440_p5 = scmp.lt.s32.totalorder %s434_s29, %s434_s29 }
   0xe   :  { %p441_p6 = por %p440_p5, %p439_p4 }
  0x10   :  { %p442_p7 = pnand %p441_p6, %p435_p3 }
  0x12   :  { %445 = shalt.err (!%p442_p7)
}
  0x13   :  { %33 = dma.hbm_to_vmem [thread:$0]  %s654_s1, 64, %s31_s19, [#allocation6]  }
  0x14   :  { %s446_s9 = scalar_lea.hbm %s653_s0, 64 }
  0x15   :  { %p447_p8 = scmp.ne.s32.totalorder %s653_s0, %s446_s9  ;;  %p450_p9 = scmp.lt.u32.totalorder %s446_s9, %s653_s0 }
  0x17   :  { %p452_p10 = pnand %p450_p9, %p447_p8 }
  0x19   :  { %455 = shalt.err (!%p452_p10)
}
  0x1a   :  { %s456_s14 = scalar_lea.vmem %s21_s21, 64  ;;  %p461_p12 = scmp.lt.s32.totalorder %s21_s21, %s21_s21 }
  0x1b   :  { %p457_p11 = scmp.ne.s32.totalorder %s21_s21, %s456_s14  ;;  %p462_p13 = scmp.lt.s32.totalorder %s456_s14, %s456_s14 }
  0x1d   :  { %p463_p0 = por %p462_p13, %p461_p12 }
  0x1f   :  { %p464_p1 = pnand %p463_p0, %p457_p11 }
  0x21   :  { %467 = shalt.err (!%p464_p1)
}
  0x22   :  { %23 = dma.hbm_to_vmem [thread:$0]  %s653_s0, 64, %s21_s21, [#allocation3]  }
  0x23   :  { %s544_s16 = smov [#allocation7]   ;;  %s468_s20 = scalar_lea.hbm %s655_s2, 4096 }
  0x24   :  { %s39_s17 = sshll.u32 %s544_s16, 4  ;;  %p469_p2 = scmp.ne.s32.totalorder %s655_s2, %s468_s20  ;;  %s40_s17 = int_to_ptr.vmem [resolvable:$true] %s39_s17 }
  0x25   :  { %p472_p3 = scmp.lt.u32.totalorder %s468_s20, %s655_s2 }
  0x27   :  { %p474_p4 = pnand %p472_p3, %p469_p2 }
  0x29   :  { %477 = shalt.err (!%p474_p4)
}
  0x2a   :  { %s478_s26 = scalar_lea.vmem %s40_s17, 4096  ;;  %p483_p6 = scmp.lt.s32.totalorder %s40_s17, %s40_s17 }
  0x2b   :  { %p479_p5 = scmp.ne.s32.totalorder %s40_s17, %s478_s26  ;;  %p484_p7 = scmp.lt.s32.totalorder %s478_s26, %s478_s26 }
  0x2d   :  { %p485_p8 = por %p484_p7, %p483_p6 }
  0x2f   :  { %p486_p9 = pnand %p485_p8, %p479_p5 }
  0x31   :  { %489 = shalt.err (!%p486_p9)
}
  0x32   :  { %s545_s0 = smov 256   ;;  %s546_s21 = smov 16  }
  0x33   :  { %45 = dma.hbm_to_vmem [thread:$0]  %s655_s2, 4096, %s40_s17, [#allocation6], %s545_s0, %s545_s0, %s546_s21  }
  0x34   :  { %s547_s29 = smov [#allocation8]   ;;  %s490_s8 = scalar_lea.hbm %s656_s3, 4096 }
  0x35   :  { %s51_s30 = sshll.u32 %s547_s29, 4  ;;  %p491_p10 = scmp.ne.s32.totalorder %s656_s3, %s490_s8  ;;  %s52_s30 = int_to_ptr.vmem [resolvable:$true] %s51_s30 }
  0x36   :  { %p494_p11 = scmp.lt.u32.totalorder %s490_s8, %s656_s3 }
  0x38   :  { %p496_p12 = pnand %p494_p11, %p491_p10 }
  0x3a   :  { %499 = shalt.err (!%p496_p12)
}
  0x3b   :  { %s500_s13 = scalar_lea.vmem %s52_s30, 4096  ;;  %p505_p0 = scmp.lt.s32.totalorder %s52_s30, %s52_s30 }
  0x3c   :  { %p501_p13 = scmp.ne.s32.totalorder %s52_s30, %s500_s13  ;;  %p506_p1 = scmp.lt.s32.totalorder %s500_s13, %s500_s13 }
  0x3e   :  { %p507_p2 = por %p506_p1, %p505_p0 }
  0x40   :  { %p508_p3 = pnand %p507_p2, %p501_p13 }
  0x42   :  { %511 = shalt.err (!%p508_p3)
}
  0x43   :  { %57 = dma.hbm_to_vmem [thread:$0]  %s656_s3, 4096, %s52_s30, [#allocation9], %s545_s0, %s545_s0, %s546_s21  }
  0x44   :  { %534 = dma.done.wait [#allocation3], 64  }
  0x45   :  { %535 = vsyncadd [#allocation3], 4294967232 }
  0x46   :  { %536 = dma.done.wait [#allocation6], 4160  }
  0x47   :  { %537 = vsyncadd [#allocation6], 4294963136 }
  0x48   :  { %538 = dma.done.wait [#allocation9], 4096  }
  0x49   :  { %539 = vsyncadd [#allocation9], 4294963200  ;;  %v548_v0 = vmov 0.0   ;;  %v136_v1 = vld [vmem:[#allocation8 + $0x8] sm:$0xff]  ;;  %v138_v2 = vld [vmem:[#allocation8 + $0x18] sm:$0xff]  ;;  %s549_s3 = smov 96  }
  0x4a   :  { %231 = vmatprep.mubr.f32.mxu1 %v548_v0  ;;  %302 = vmatprep.mubr.f32.mxu0 %v548_v0  ;;  %v104_v3 = vld [vmem:[#allocation7 + $0x8] sm:$0xff]  ;;  %v347_v4 = vpack.c.bf16 %v138_v2, %v136_v1  ;;  %v106_v5 = vld [vmem:[#allocation7 + $0x18] sm:$0xff]  ;;  %v135_v6 = vld [vmem:[#allocation8] sm:$0xff]  ;;  %s550_s1 = smov 32   ;;  %s551_s15 = smov 64   ;;  %vm94_vm0 = vcmask 261120  }
  0x4b   :  { %v137_v7 = vld [vmem:[#allocation8 + $0x10] sm:$0xff]  ;;  %v379_v8 = vpack.c.bf16 %v106_v5, %v104_v3  ;;  %v103_v10 = vld [vmem:[#allocation7] sm:$0xff]  ;;  %v140_v12 = vld [vmem:[#allocation8 + $0x28] sm:$0xff]  ;;  %vm96_vm1 = vcmask 523264   ;;  %vm98_vm2 = vcmask 785408  }
  0x4c   :  { %v349_v9 = vpack.c.bf16 %v137_v7, %v135_v6  ;;  %v105_v11 = vld [vmem:[#allocation7 + $0x10] sm:$0xff]  ;;  %348 = vmatprep.subr.bf16.mxu1 %v347_v4  ;;  %v142_v14 = vld [vmem:[#allocation8 + $0x38] sm:$0xff]  ;;  %v108_v15 = vld [vmem:[#allocation7 + $0x28] sm:$0xff] }
  0x4d   :  { %v381_v13 = vpack.c.bf16 %v105_v11, %v103_v10  ;;  %v110_v16 = vld [vmem:[#allocation7 + $0x38] sm:$0xff]  ;;  %380 = vmatprep.subr.bf16.mxu0 %v379_v8  ;;  %v351_v17 = vpack.c.bf16 %v142_v14, %v140_v12  ;;  %v139_v19 = vld [vmem:[#allocation8 + $0x20] sm:$0xff]  ;;  %v141_v20 = vld [vmem:[#allocation8 + $0x30] sm:$0xff] }
  0x4e   :  { %350 = vmatpush1.bf16.msra.mxu1 %v349_v9  ;;  %v383_v18 = vpack.c.bf16 %v110_v16, %v108_v15  ;;  %v107_v21 = vld [vmem:[#allocation7 + $0x20] sm:$0xff]  ;;  %v353_v22 = vpack.c.bf16 %v141_v20, %v139_v19  ;;  %v109_v23 = vld [vmem:[#allocation7 + $0x30] sm:$0xff]  ;;  %v144_v24 = vld [vmem:[#allocation8 + $0x48] sm:$0xff] }
  0x4f   :  { %382 = vmatpush1.bf16.msra.mxu0 %v381_v13  ;;  %v146_v25 = vld [vmem:[#allocation8 + $0x58] sm:$0xff]  ;;  %352 = vmatprep.subr.bf16.mxu1 %v351_v17  ;;  %v385_v26 = vpack.c.bf16 %v109_v23, %v107_v21  ;;  %v112_v28 = vld [vmem:[#allocation7 + $0x48] sm:$0xff]  ;;  %v143_v30 = vld [vmem:[#allocation8 + $0x40] sm:$0xff] }
  0x50   :  { %384 = vmatprep.subr.bf16.mxu0 %v383_v18  ;;  %v355_v27 = vpack.c.bf16 %v146_v25, %v144_v24  ;;  %v114_v29 = vld [vmem:[#allocation7 + $0x58] sm:$0xff]  ;;  %v145_v32 = vld [vmem:[#allocation8 + $0x50] sm:$0xff]  ;;  %v111_v33 = vld [vmem:[#allocation7 + $0x40] sm:$0xff] }
  0x51   :  { %v387_v31 = vpack.c.bf16 %v114_v29, %v112_v28  ;;  %v113_v34 = vld [vmem:[#allocation7 + $0x50] sm:$0xff]  ;;  %v357_v35 = vpack.c.bf16 %v145_v32, %v143_v30  ;;  %v148_v36 = vld [vmem:[#allocation8 + $0x68] sm:$0xff]  ;;  %v150_v37 = vld [vmem:[#allocation8 + $0x78] sm:$0xff] }
  0x52   :  { %354 = vmatpush1.bf16.msra.mxu1 %v353_v22  ;;  %v116_v38 = vld [vmem:[#allocation7 + $0x68] sm:$0xff]  ;;  %v389_v39 = vpack.c.bf16 %v113_v34, %v111_v33  ;;  %v359_v40 = vpack.c.bf16 %v150_v37, %v148_v36  ;;  %v118_v41 = vld [vmem:[#allocation7 + $0x78] sm:$0xff]  ;;  %v147_v42 = vld [vmem:[#allocation8 + $0x60] sm:$0xff]  ;;  %v311_v36 = vlaneseq }
  0x53   :  { %386 = vmatpush1.bf16.msra.mxu0 %v385_v26  ;;  %356 = vmatprep.subr.bf16.mxu1 %v355_v27  ;;  %v149_v43 = vld [vmem:[#allocation8 + $0x70] sm:$0xff]  ;;  %v391_v44 = vpack.c.bf16 %v118_v41, %v116_v38  ;;  %v115_v45 = vld [vmem:[#allocation7 + $0x60] sm:$0xff]  ;;  %v152_v47 = vld [vmem:[#allocation8 + $0x88] sm:$0xff] }
  0x54   :  { %388 = vmatprep.subr.bf16.mxu0 %v387_v31  ;;  %v117_v46 = vld [vmem:[#allocation7 + $0x70] sm:$0xff]  ;;  %v154_v48 = vld [vmem:[#allocation8 + $0x98] sm:$0xff]  ;;  %v120_v49 = vld [vmem:[#allocation7 + $0x88] sm:$0xff]  ;;  %v361_v51 = vpack.c.bf16 %v149_v43, %v147_v42  ;;  %v312_v38 = vshrl.u32 %v311_v36, 7 }
  0x55   :  { %v122_v50 = vld [vmem:[#allocation7 + $0x98] sm:$0xff]  ;;  %v393_v52 = vpack.c.bf16 %v117_v46, %v115_v45  ;;  %v363_v53 = vpack.c.bf16 %v154_v48, %v152_v47  ;;  %v151_v54 = vld [vmem:[#allocation8 + $0x80] sm:$0xff]  ;;  %v153_v55 = vld [vmem:[#allocation8 + $0x90] sm:$0xff] }
  0x56   :  { %358 = vmatpush1.bf16.msra.mxu1 %v357_v35  ;;  %v119_v56 = vld [vmem:[#allocation7 + $0x80] sm:$0xff]  ;;  %v395_v57 = vpack.c.bf16 %v122_v50, %v120_v49  ;;  %v121_v58 = vld [vmem:[#allocation7 + $0x90] sm:$0xff]  ;;  %v156_v59 = vld [vmem:[#allocation8 + $0xa8] sm:$0xff]  ;;  %v365_v63 = vpack.c.bf16 %v153_v55, %v151_v54  ;;  %v313_v41 = vsub.s32 0, %v312_v38  ;;  %v317_v43 = vsub.s32 1, %v312_v38 }
  0x57   :  { %390 = vmatpush1.bf16.msra.mxu0 %v389_v39  ;;  %360 = vmatprep.subr.bf16.mxu1 %v359_v40  ;;  %v158_v60 = vld [vmem:[#allocation8 + $0xb8] sm:$0xff]  ;;  %v124_v61 = vld [vmem:[#allocation7 + $0xa8] sm:$0xff]  ;;  %v397_v0 = vpack.c.bf16 %v121_v58, %v119_v56  ;;  %v155_v2 = vld [vmem:[#allocation8 + $0xa0] sm:$0xff] }
  0x58   :  { %392 = vmatprep.subr.bf16.mxu0 %v391_v44  ;;  %v126_v62 = vld [vmem:[#allocation7 + $0xb8] sm:$0xff]  ;;  %v367_v1 = vpack.c.bf16 %v158_v60, %v156_v59  ;;  %v157_v3 = vld [vmem:[#allocation8 + $0xb0] sm:$0xff]  ;;  %v123_v4 = vld [vmem:[#allocation7 + $0xa0] sm:$0xff] }
  0x59   :  { %v399_v5 = vpack.c.bf16 %v126_v62, %v124_v61  ;;  %v125_v6 = vld [vmem:[#allocation7 + $0xb0] sm:$0xff]  ;;  %v160_v7 = vld [vmem:[#allocation8 + $0xc8] sm:$0xff]  ;;  %v162_v8 = vld [vmem:[#allocation8 + $0xd8] sm:$0xff]  ;;  %v369_v11 = vpack.c.bf16 %v157_v3, %v155_v2 }
  0x5a   :  { %362 = vmatpush1.bf16.msra.mxu1 %v361_v51  ;;  %v128_v9 = vld [vmem:[#allocation7 + $0xc8] sm:$0xff]  ;;  %v130_v10 = vld [vmem:[#allocation7 + $0xd8] sm:$0xff]  ;;  %v159_v12 = vld [vmem:[#allocation8 + $0xc0] sm:$0xff]  ;;  %v401_v13 = vpack.c.bf16 %v125_v6, %v123_v4  ;;  %v371_v14 = vpack.c.bf16 %v162_v8, %v160_v7 }
  0x5b   :  { %394 = vmatpush1.bf16.msra.mxu0 %v393_v52  ;;  %364 = vmatprep.subr.bf16.mxu1 %v363_v53  ;;  %v161_v15 = vld [vmem:[#allocation8 + $0xd0] sm:$0xff]  ;;  %v127_v16 = vld [vmem:[#allocation7 + $0xc0] sm:$0xff]  ;;  %v631_v17 = vld [vmem:[#allocation5] sm:$0xf]  ;;  %v403_v18 = vpack.c.bf16 %v130_v10, %v128_v9 }
  0x5c   :  { %396 = vmatprep.subr.bf16.mxu0 %v395_v57  ;;  %v129_v19 = vld [vmem:[#allocation7 + $0xd0] sm:$0xff]  ;;  %v164_v20 = vld [vmem:[#allocation8 + $0xe8] sm:$0xff]  ;;  %v166_v21 = vld [vmem:[#allocation8 + $0xf8] sm:$0xff]  ;;  %88 = vrot.lane.b32.xlu1 %v631_v17, %s549_s3  ;;  %v373_v24 = vpack.c.bf16 %v161_v15, %v159_v12 }
  0x5d   :  { %v132_v22 = vld [vmem:[#allocation7 + $0xe8] sm:$0xff]  ;;  %v134_v23 = vld [vmem:[#allocation7 + $0xf8] sm:$0xff]  ;;  %75 = vrot.lane.b32.xlu0 %v631_v17, %s550_s1  ;;  %v405_v25 = vpack.c.bf16 %v129_v19, %v127_v16  ;;  %v375_v26 = vpack.c.bf16 %v166_v21, %v164_v20  ;;  %v163_v27 = vld [vmem:[#allocation8 + $0xe0] sm:$0xff] }
  0x5e   :  { %366 = vmatpush1.bf16.msra.mxu1 %v365_v63  ;;  %v165_v28 = vld [vmem:[#allocation8 + $0xf0] sm:$0xff]  ;;  %v72_v29 = vld [vmem:[#allocation2] sm:$0xf]  ;;  %v407_v30 = vpack.c.bf16 %v134_v23, %v132_v22  ;;  %v131_v31 = vld [vmem:[#allocation7 + $0xe0] sm:$0xff] }
  0x5f   :  { %398 = vmatpush1.bf16.msra.mxu0 %v397_v0  ;;  %368 = vmatprep.subr.bf16.mxu1 %v367_v1  ;;  %v133_v32 = vld [vmem:[#allocation7 + $0xf0] sm:$0xff]  ;;  %v377_v33 = vpack.c.bf16 %v165_v28, %v163_v27  ;;  %v309_v42 = vld [vmem:[%s657_s4] sm:$0x3]  ;;  %s552_s4 = smov [#allocation10]  }
  0x60   :  { %400 = vmatprep.subr.bf16.mxu0 %v399_v5  ;;  %79 = vrot.lane.b32.xlu1 %v72_v29, %s550_s1  ;;  %v409_v34 = vpack.c.bf16 %v133_v32, %v131_v31  ;;  %v314_v48 = vrot.slane %v309_v42, %v313_v41  ;;  %v318_v51 = vrot.slane %v309_v42, %v317_v43  ;;  %s336_s18 = sshll.u32 %s552_s4, 4  ;;  %s337_s18 = int_to_ptr.vmem [resolvable:$true] %s336_s18 }
  0x61   :  { %85 = vrot.lane.b32.xlu0 %v72_v29, %s551_s15  ;;  %s512_s19 = scalar_lea.vmem %s337_s18, 128  ;;  %p517_p5 = scmp.lt.s32.totalorder %s337_s18, %s337_s18 }
  0x62   :  { %370 = vmatpush1.bf16.msra.mxu1 %v369_v11  ;;  %p513_p4 = scmp.ne.s32.totalorder %s337_s18, %s512_s19  ;;  %p518_p6 = scmp.lt.s32.totalorder %s512_s19, %s512_s19 }
  0x63   :  { %402 = vmatpush1.bf16.msra.mxu0 %v401_v13  ;;  %372 = vmatprep.subr.bf16.mxu1 %v371_v14 }
  0x64   :  { %404 = vmatprep.subr.bf16.mxu0 %v403_v18  ;;  %82 = vrot.lane.b32.xlu1 %v631_v17, %s551_s15  ;;  %p519_p7 = por %p518_p6, %p517_p5 }
  0x65   :  { %91 = vrot.lane.b32.xlu0 %v72_v29, %s549_s3 }
  0x66   :  { %374 = vmatpush1.bf16.msra.mxu1 %v373_v24  ;;  %p520_p8 = pnand %p519_p7, %p513_p4 }
  0x67   :  { %406 = vmatpush1.bf16.msra.mxu0 %v405_v25  ;;  %376 = vmatprep.subr.bf16.mxu1 %v375_v26 }
  0x68   :  { %408 = vmatprep.subr.bf16.mxu0 %v407_v30 }
  0x6a   :  { %378 = vmatpush1.bf16.msra.mxu1 %v377_v33 }
  0x6b   :  { %410 = vmatpush1.bf16.msra.mxu0 %v409_v34 }
  0x6d   :  { %232 = vmatmul.mubr.f32.vlgmr.msra.gmra.mrb[0].mxu1 %v631_v17 }
  0x6e   :  { %303 = vmatmul.mubr.f32.vlgmr.msra.gmra.mrb[0].mxu0 %v72_v29 }
  0xce   :  { %v89_v37 = vpop.permute.xlu1 %88 }
  0xcf   :  { %v76_v35 = vpop.permute.xlu0 %75 }
  0xd0   :  { %v95_v44 = vsel %vm94_vm0, %v72_v29, %v76_v35 }
  0xd2   :  { %v80_v40 = vpop.permute.xlu1 %79 }
  0xd3   :  { %v86_v39 = vpop.permute.xlu0 %85  ;;  %v97_v52 = vsel %vm96_vm1, %v95_v44, %v80_v40 }
  0xd4   :  { %v100_v45 = vsel %vm94_vm0, %v86_v39, %v89_v37 }
  0xd6   :  { %v83_v53 = vpop.permute.xlu1 %82 }
  0xd7   :  { %v92_v46 = vpop.permute.xlu0 %91  ;;  %v99_v59 = vsel %vm98_vm2, %v97_v52, %v83_v53 }
  0xd8   :  { %v101_v56 = vsel %vm96_vm1, %v100_v45, %v92_v46 }
  0xd9   :  { %v102_v61 = vsel %vm98_vm2, %v101_v56, %v631_v17 }
 0x140   :  { %v233_v47 = vpop.f32.mrb[0].mxu1 }
 0x141   :  { %v304_v49 = vpop.f32.mrb[0].mxu0  ;;  %v235_v50 = vpop.f32.mrb[1].mxu1 }
 0x142   :  { %v305_v54 = vadd.f32 %v304_v49, %v233_v47  ;;  %v306_v55 = vpop.f32.mrb[1].mxu0 }
 0x143   :  { %v307_v57 = vadd.f32 %v306_v55, %v235_v50 }
 0x144   :  { %v321_v58 = vadd.f32 %v314_v48, %v305_v54 }
 0x145   :  { %v322_v60 = vadd.f32 %v318_v51, %v307_v57 }
 0x146   :  { %v323_v62 = vmul.f32 %v321_v58, %v99_v59 }
 0x147   :  { %v324_v63 = vmul.f32 %v322_v60, %v102_v61 }
 0x149   :  { %v327_v0 = vcombine.low %v323_v62, %v324_v63 }
 0x14b   :  { %329 = vst [vmem:[#allocation10] sm:$0xff] %v327_v0 }
 0x14c   :  { %523 = shalt.err (!%p520_p8)
}
 0x14d   :  { %s524_s23 = scalar_lea.hbm %s658_s5, 128 }
 0x14e   :  { %p525_p9 = scmp.ne.s32.totalorder %s658_s5, %s524_s23  ;;  %p528_p10 = scmp.lt.u32.totalorder %s524_s23, %s658_s5 }
 0x150   :  { %p530_p11 = pnand %p528_p10, %p525_p9 }
 0x152   :  { %533 = shalt.err (!%p530_p11)
}
 0x153   :  { %339 = dma.vmem_to_hbm [thread:$0]  %s337_s18, 128, %s658_s5, [#allocation4]  }
 0x154   :  { %540 = dma.done.wait [#allocation4], 128  }
 0x155   :  { %541 = vsyncadd [#allocation4], 4294967168 }
 0x156   :  { %343 = vsyncpa [#allocation3], 1 }
 0x157   :  { %344 = vsyncpa [#allocation6], 1 }
 0x158   :  { %345 = vsyncpa [#allocation9], 1 }
 0x159   :  { %346 = vsyncpa [#allocation4], 1 }

</bundles_post_ra>
